<compile_context>
chip_gen: v6e
topology: v6e:2x2x1
jax: 0.10.0
libtpu: 0.0.40
codegen_flags: <defaults>
</compile_context>

<pallas_src>
import functools

import jax
import jax.numpy as jnp
from jax.experimental import pallas as pl
from jax.experimental.pallas import tpu as pltpu

LANES = 128          # fast lane width
SUBLANES = 8
MAX_TILE_R = 1024    # 8 * 1024 * 128 * 4 B = 4 MiB per input block (x2 buffers = 8 MiB)
STRIP_R = 64         # sublane strip processed per inner step (keeps temps vreg-sized)
MIN_SPLIT_ROWS = 64  # >= 2*this many rows (~16k boxes) -> force grid_n >= 2 (v7x 2-TC)


def _round_up(x, m):
    return ((x + m - 1) // m) * m


def _iou_loss_kernel(pb_ref, out_ref, *, eps, tile_r):
    """pb_ref: (8, tile_r, 128) f32 block; rows 0..3 = preds[x1,y1,x2,y2], 4..7 = bbox.

    out_ref: (1, 8, 128) partial-sum block for this grid step.
    """
    acc = jnp.zeros((SUBLANES, LANES), jnp.float32)
    r0 = 0
    while r0 < tile_r:                      # static (trace-time) strip loop
        sr = min(STRIP_R, tile_r - r0)      # always a multiple of 8
        sl = pl.ds(r0, sr)

        px1 = pb_ref[0, sl, :]
        py1 = pb_ref[1, sl, :]
        px2 = pb_ref[2, sl, :]
        py2 = pb_ref[3, sl, :]
        bx1 = pb_ref[4, sl, :]
        by1 = pb_ref[5, sl, :]
        bx2 = pb_ref[6, sl, :]
        by2 = pb_ref[7, sl, :]

        x1 = jnp.maximum(px1, bx1)
        y1 = jnp.maximum(py1, by1)
        x2 = jnp.minimum(px2, bx2)
        y2 = jnp.minimum(py2, by2)

        w = jnp.maximum(x2 - x1 + 1.0, 0.0)
        h = jnp.maximum(y2 - y1 + 1.0, 0.0)
        inters = w * h

        uni = ((px2 - px1 + 1.0) * (py2 - py1 + 1.0)
               + (bx2 - bx1 + 1.0) * (by2 - by1 + 1.0)
               - inters)

        # Exact divide kept (approx EUP reciprocal changes ULPs beyond 1e-5 tol).
        ious = jnp.maximum(inters / uni, jnp.float32(eps))
        loss = 1.0 - ious                                   # (sr, 128)

        # Padded (all-zero) boxes -> w = h = inters = uni = 1 -> loss = 0: no mask needed.
        # Fold sublane groups with elementwise adds only (VPU; no cross-lane reduce).
        acc = acc + loss.reshape(-1, SUBLANES, LANES).sum(axis=0)
        r0 += sr

    out_ref[0] = acc


def iou_loss(preds, bbox, eps=1e-6, reduction="mean"):
    """preds, bbox: (N, 4) float32 [x1, y1, x2, y2]. Returns scalar loss."""
    assert preds.shape == bbox.shape and preds.ndim == 2 and preds.shape[1] == 4
    if reduction not in ("mean", "sum"):
        raise NotImplementedError
    n = preds.shape[0]

    if n == 0:
        # Matches torch: sum of empty = 0, mean of empty = NaN (0/0).
        s = jnp.float32(0.0)
        return s / jnp.float32(n) if reduction == "mean" else s

    rows = pl.cdiv(n, LANES)
    grid_n = pl.cdiv(rows, MAX_TILE_R)
    if rows >= 2 * MIN_SPLIT_ROWS:
        grid_n = max(grid_n, 2)                 # let v7x shard across both TCs
    tile_r = _round_up(pl.cdiv(rows, grid_n), SUBLANES)
    rows_pad = grid_n * tile_r
    n_pad = rows_pad * LANES

    # Single repack pass: (N,4)+(N,4) -> (N,8) -> pad -> transpose ->
    # (8, rows_pad, 128) lane-dense coordinate slab (one DMA stream).
    pb = jnp.concatenate([preds.astype(jnp.float32), bbox.astype(jnp.float32)], axis=1)
    pb = jnp.pad(pb, ((0, n_pad - n), (0, 0)))
    pb = pb.T.reshape(8, rows_pad, LANES)

    kernel = functools.partial(_iou_loss_kernel, eps=float(eps), tile_r=tile_r)

    partials = pl.pallas_call(
        kernel,
        out_shape=jax.ShapeDtypeStruct((grid_n, SUBLANES, LANES), jnp.float32),
        grid_spec=pltpu.PrefetchScalarGridSpec(
            num_scalar_prefetch=0,
            grid=(grid_n,),
            in_specs=[pl.BlockSpec((8, tile_r, LANES), lambda i: (0, i, 0))],
            out_specs=pl.BlockSpec((1, SUBLANES, LANES), lambda i: (i, 0, 0)),
        ),
        compiler_params=pltpu.CompilerParams(
            dimension_semantics=("parallel",),
            vmem_limit_bytes=32 * 1024 * 1024,   # headroom for 8 MiB double-buffered input on v5e
        ),
    )(pb)

    loss_sum = jnp.sum(partials)
    if reduction == "mean":
        return loss_sum / jnp.float32(n)
    return loss_sum


def _reference(preds, bbox, eps=1e-6, reduction="mean"):
    x1 = jnp.maximum(preds[:, 0], bbox[:, 0])
    y1 = jnp.maximum(preds[:, 1], bbox[:, 1])
    x2 = jnp.minimum(preds[:, 2], bbox[:, 2])
    y2 = jnp.minimum(preds[:, 3], bbox[:, 3])
    w = jnp.maximum(x2 - x1 + 1.0, 0.0)
    h = jnp.maximum(y2 - y1 + 1.0, 0.0)
    inters = w * h
    uni = ((preds[:, 2] - preds[:, 0] + 1.0) * (preds[:, 3] - preds[:, 1] + 1.0)
           + (bbox[:, 2] - bbox[:, 0] + 1.0) * (bbox[:, 3] - bbox[:, 1] + 1.0)
           - inters)
    ious = jnp.maximum(inters / uni, eps)
    loss = 1.0 - ious
    return jnp.mean(loss) if reduction == "mean" else jnp.sum(loss)


if __name__ == "__main__":
    key = jax.random.PRNGKey(0)
    k1, k2, k3, k4 = jax.random.split(key, 4)
    N = 300  # not a multiple of 128 -> exercises the padding path

    # Well-formed boxes: [x1, y1, x2, y2] with x2 >= x1, y2 >= y1.
    p_xy = jax.random.uniform(k1, (N, 2), jnp.float32, 0.0, 50.0)
    p_wh = jax.random.uniform(k2, (N, 2), jnp.float32, 1.0, 30.0)
    preds = jnp.concatenate([p_xy, p_xy + p_wh], axis=1)

    b_xy = jax.random.uniform(k3, (N, 2), jnp.float32, 0.0, 50.0)
    b_wh = jax.random.uniform(k4, (N, 2), jnp.float32, 1.0, 30.0)
    bbox = jnp.concatenate([b_xy, b_xy + b_wh], axis=1)

    out_mean = jax.block_until_ready(iou_loss(preds, bbox))
    ref_mean = jax.block_until_ready(_reference(preds, bbox))
    assert jnp.allclose(out_mean, ref_mean, rtol=1e-5, atol=1e-5), (out_mean, ref_mean)

    out_sum = jax.block_until_ready(iou_loss(preds, bbox, reduction="sum"))
    ref_sum = jax.block_until_ready(_reference(preds, bbox, reduction="sum"))
    assert jnp.allclose(out_sum, ref_sum, rtol=1e-5, atol=1e-4), (out_sum, ref_sum)

    print("KERNEL_OK")
</pallas_src>

<mosaic_0001>
module attributes {stable_mosaic.version = 11 : i64} {
  func.func @_iou_loss_kernel(%arg0: i32, %arg1: memref<8x8x128xf32, #tpu.memory_space<vmem>>, %arg2: memref<1x8x128xf32, #tpu.memory_space<vmem>>) attributes {dimension_semantics = [#tpu.dimension_semantics<parallel>], iteration_bounds = array<i64: 1>, scalar_prefetch = 0 : i64, scratch_operands = 0 : i64, tpu.core_type = #tpu.core_type<tc>, window_params = [{transform_indices = @transform_0, window_bounds = array<i64: 8, 8, 128>}, {transform_indices = @transform_1, window_bounds = array<i64: 1, 8, 128>}]} {
    %cst = arith.constant 0.000000e+00 : f32
    %0 = vector.broadcast %cst : f32 to vector<8x128xf32>
    %c0 = arith.constant 0 : index
    %c0_0 = arith.constant 0 : index
    %c0_1 = arith.constant 0 : index
    %1 = vector.load %arg1[%c0, %c0_0, %c0_1] : memref<8x8x128xf32, #tpu.memory_space<vmem>>, vector<1x8x128xf32>
    %2 = vector.shape_cast %1 : vector<1x8x128xf32> to vector<8x128xf32>
    %c1 = arith.constant 1 : index
    %c0_2 = arith.constant 0 : index
    %c0_3 = arith.constant 0 : index
    %3 = vector.load %arg1[%c1, %c0_2, %c0_3] : memref<8x8x128xf32, #tpu.memory_space<vmem>>, vector<1x8x128xf32>
    %4 = vector.shape_cast %3 : vector<1x8x128xf32> to vector<8x128xf32>
    %c2 = arith.constant 2 : index
    %c0_4 = arith.constant 0 : index
    %c0_5 = arith.constant 0 : index
    %5 = vector.load %arg1[%c2, %c0_4, %c0_5] : memref<8x8x128xf32, #tpu.memory_space<vmem>>, vector<1x8x128xf32>
    %6 = vector.shape_cast %5 : vector<1x8x128xf32> to vector<8x128xf32>
    %c3 = arith.constant 3 : index
    %c0_6 = arith.constant 0 : index
    %c0_7 = arith.constant 0 : index
    %7 = vector.load %arg1[%c3, %c0_6, %c0_7] : memref<8x8x128xf32, #tpu.memory_space<vmem>>, vector<1x8x128xf32>
    %8 = vector.shape_cast %7 : vector<1x8x128xf32> to vector<8x128xf32>
    %c4 = arith.constant 4 : index
    %c0_8 = arith.constant 0 : index
    %c0_9 = arith.constant 0 : index
    %9 = vector.load %arg1[%c4, %c0_8, %c0_9] : memref<8x8x128xf32, #tpu.memory_space<vmem>>, vector<1x8x128xf32>
    %10 = vector.shape_cast %9 : vector<1x8x128xf32> to vector<8x128xf32>
    %c5 = arith.constant 5 : index
    %c0_10 = arith.constant 0 : index
    %c0_11 = arith.constant 0 : index
    %11 = vector.load %arg1[%c5, %c0_10, %c0_11] : memref<8x8x128xf32, #tpu.memory_space<vmem>>, vector<1x8x128xf32>
    %12 = vector.shape_cast %11 : vector<1x8x128xf32> to vector<8x128xf32>
    %c6 = arith.constant 6 : index
    %c0_12 = arith.constant 0 : index
    %c0_13 = arith.constant 0 : index
    %13 = vector.load %arg1[%c6, %c0_12, %c0_13] : memref<8x8x128xf32, #tpu.memory_space<vmem>>, vector<1x8x128xf32>
    %14 = vector.shape_cast %13 : vector<1x8x128xf32> to vector<8x128xf32>
    %c7 = arith.constant 7 : index
    %c0_14 = arith.constant 0 : index
    %c0_15 = arith.constant 0 : index
    %15 = vector.load %arg1[%c7, %c0_14, %c0_15] : memref<8x8x128xf32, #tpu.memory_space<vmem>>, vector<1x8x128xf32>
    %16 = vector.shape_cast %15 : vector<1x8x128xf32> to vector<8x128xf32>
    %17 = arith.maximumf %2, %10 : vector<8x128xf32>
    %18 = arith.maximumf %4, %12 : vector<8x128xf32>
    %19 = arith.minimumf %6, %14 : vector<8x128xf32>
    %20 = arith.minimumf %8, %16 : vector<8x128xf32>
    %21 = arith.subf %19, %17 : vector<8x128xf32>
    %cst_16 = arith.constant 1.000000e+00 : f32
    %22 = vector.broadcast %cst_16 : f32 to vector<8x128xf32>
    %23 = arith.addf %21, %22 : vector<8x128xf32>
    %cst_17 = arith.constant 0.000000e+00 : f32
    %24 = vector.broadcast %cst_17 : f32 to vector<8x128xf32>
    %25 = arith.maximumf %23, %24 : vector<8x128xf32>
    %26 = arith.subf %20, %18 : vector<8x128xf32>
    %cst_18 = arith.constant 1.000000e+00 : f32
    %27 = vector.broadcast %cst_18 : f32 to vector<8x128xf32>
    %28 = arith.addf %26, %27 : vector<8x128xf32>
    %cst_19 = arith.constant 0.000000e+00 : f32
    %29 = vector.broadcast %cst_19 : f32 to vector<8x128xf32>
    %30 = arith.maximumf %28, %29 : vector<8x128xf32>
    %31 = arith.mulf %25, %30 : vector<8x128xf32>
    %32 = arith.subf %6, %2 : vector<8x128xf32>
    %cst_20 = arith.constant 1.000000e+00 : f32
    %33 = vector.broadcast %cst_20 : f32 to vector<8x128xf32>
    %34 = arith.addf %32, %33 : vector<8x128xf32>
    %35 = arith.subf %8, %4 : vector<8x128xf32>
    %cst_21 = arith.constant 1.000000e+00 : f32
    %36 = vector.broadcast %cst_21 : f32 to vector<8x128xf32>
    %37 = arith.addf %35, %36 : vector<8x128xf32>
    %38 = arith.mulf %34, %37 : vector<8x128xf32>
    %39 = arith.subf %14, %10 : vector<8x128xf32>
    %cst_22 = arith.constant 1.000000e+00 : f32
    %40 = vector.broadcast %cst_22 : f32 to vector<8x128xf32>
    %41 = arith.addf %39, %40 : vector<8x128xf32>
    %42 = arith.subf %16, %12 : vector<8x128xf32>
    %cst_23 = arith.constant 1.000000e+00 : f32
    %43 = vector.broadcast %cst_23 : f32 to vector<8x128xf32>
    %44 = arith.addf %42, %43 : vector<8x128xf32>
    %45 = arith.mulf %41, %44 : vector<8x128xf32>
    %46 = arith.addf %38, %45 : vector<8x128xf32>
    %47 = arith.subf %46, %31 : vector<8x128xf32>
    %48 = arith.divf %31, %47 : vector<8x128xf32>
    %cst_24 = arith.constant 9.99999997E-7 : f32
    %49 = vector.broadcast %cst_24 : f32 to vector<8x128xf32>
    %50 = arith.maximumf %48, %49 : vector<8x128xf32>
    %cst_25 = arith.constant 1.000000e+00 : f32
    %51 = vector.broadcast %cst_25 : f32 to vector<8x128xf32>
    %52 = arith.subf %51, %50 : vector<8x128xf32>
    %53 = vector.shape_cast %52 : vector<8x128xf32> to vector<1x8x128xf32>
    %cst_26 = arith.constant dense<0.000000e+00> : vector<8x128xf32>
    %54 = vector.multi_reduction <add>, %53, %cst_26 [0] : vector<1x8x128xf32> to vector<8x128xf32>
    %55 = arith.addf %0, %54 : vector<8x128xf32>
    %c0_27 = arith.constant 0 : index
    %c0_28 = arith.constant 0 : index
    %c0_29 = arith.constant 0 : index
    %56 = vector.load %arg2[%c0_27, %c0_28, %c0_29] : memref<1x8x128xf32, #tpu.memory_space<vmem>>, vector<1x8x128xf32>
    %57 = vector.shape_cast %56 : vector<1x8x128xf32> to vector<8x128xf32>
    %58 = vector.shape_cast %55 : vector<8x128xf32> to vector<1x8x128xf32>
    tpu.vector_store %arg2[%c0_27, %c0_28, %c0_29], %58 {strides = array<i32>} : memref<1x8x128xf32, #tpu.memory_space<vmem>>, vector<1x8x128xf32>,
    return
  }
  func.func @transform_0(%arg0: i32) -> (i32, i32, i32) {
    %c0_i32 = arith.constant 0 : i32
    %c0_i32_0 = arith.constant 0 : i32
    %c0_i32_1 = arith.constant 0 : i32
    return %c0_i32, %arg0, %c0_i32_0 : i32, i32, i32
  }
  func.func @transform_1(%arg0: i32) -> (i32, i32, i32) {
    %c0_i32 = arith.constant 0 : i32
    %c0_i32_0 = arith.constant 0 : i32
    %c0_i32_1 = arith.constant 0 : i32
    return %arg0, %c0_i32, %c0_i32_0 : i32, i32, i32
  }
}

</mosaic_0001>

<bundles_post_ra>
// kernel: tpu_custom_call.1
= control target key start
LH: loop header
LB: loop body
LE: loop exit
PB: predicated region body
PF: predicated region fallthrough
CT: control target
= control target key end

     0   :  { %6 = vsyncpa [#allocation3], 0  ;;  %s153_s0 = inlined_call_operand.hbm [shape: f32[8,8,128], index: 0, kind: input, shape index: {}]   ;;  %s154_s1 = inlined_call_operand.hbm [shape: f32[1,8,128], index: 1, kind: output, shape index: {}]  }
   0x1   :  { %7 = vsyncpa [#allocation4], 0  ;;  %s133_s6 = smov [#allocation2]  }
   0x2   :  { %s13_s7 = sshll.u32 %s133_s6, 4  ;;  %s14_s7 = int_to_ptr.vmem [resolvable:$true] %s13_s7 }
   0x3   :  { %s97_s8 = scalar_lea.vmem %s14_s7, 1024  ;;  %p102_p1 = scmp.lt.s32.totalorder %s14_s7, %s14_s7 }
   0x4   :  { %p98_p0 = scmp.ne.s32.totalorder %s14_s7, %s97_s8  ;;  %p103_p2 = scmp.lt.s32.totalorder %s97_s8, %s97_s8 }
   0x6   :  { %p104_p3 = por %p103_p2, %p102_p1 }
   0x8   :  { %p105_p4 = pnand %p104_p3, %p98_p0 }
   0xa   :  { %108 = shalt.err (!%p105_p4)
}
   0xb   :  { %s134_s9 = smov 128   ;;  %s135_s10 = smov 8  }
   0xc   :  { %19 = dma.hbm_to_vmem [thread:$0]  %s153_s0, 1024, %s14_s7, [#allocation3], %s134_s9, %s134_s9, %s135_s10  }
   0xd   :  { %129 = dma.done.wait [#allocation3], 1024  }
   0xe   :  { %130 = vsyncadd [#allocation3], 4294966272  ;;  %v23_v0 = vld [vmem:[#allocation2] sm:$0xff]  ;;  %v25_v1 = vld [vmem:[#allocation2 + $0x8] sm:$0xff]  ;;  %s136_s0 = smov [#allocation5]  }
   0xf   :  { %v27_v2 = vld [vmem:[#allocation2 + $0x10] sm:$0xff]  ;;  %v29_v3 = vld [vmem:[#allocation2 + $0x18] sm:$0xff]  ;;  %v31_v4 = vld [vmem:[#allocation2 + $0x20] sm:$0xff]  ;;  %s74_s13 = sshll.u32 %s136_s0, 4  ;;  %s75_s13 = int_to_ptr.vmem [resolvable:$true] %s74_s13 }
  0x10   :  { %v33_v5 = vld [vmem:[#allocation2 + $0x28] sm:$0xff]  ;;  %v49_v6 = vsub.f32 %v27_v2, %v23_v0  ;;  %v35_v7 = vld [vmem:[#allocation2 + $0x30] sm:$0xff]  ;;  %v37_v8 = vld [vmem:[#allocation2 + $0x38] sm:$0xff]  ;;  %v38_v9 = vmax.f32 %v23_v0, %v31_v4  ;;  %v51_v11 = vsub.f32 %v29_v3, %v25_v1  ;;  %s109_s14 = scalar_lea.vmem %s75_s13, 128  ;;  %p114_p6 = scmp.lt.s32.totalorder %s75_s13, %s75_s13 }
  0x11   :  { %v39_v10 = vmax.f32 %v25_v1, %v33_v5  ;;  %v40_v12 = vmin.f32 %v27_v2, %v35_v7  ;;  %v41_v13 = vmin.f32 %v29_v3, %v37_v8  ;;  %v54_v15 = vsub.f32 %v35_v7, %v31_v4  ;;  %p110_p5 = scmp.ne.s32.totalorder %s75_s13, %s109_s14  ;;  %p115_p7 = scmp.lt.s32.totalorder %s109_s14, %s109_s14 }
  0x12   :  { %v50_v14 = vadd.f32 1.0, %v49_v6  ;;  %v52_v16 = vadd.f32 1.0, %v51_v11  ;;  %v56_v17 = vsub.f32 %v37_v8, %v33_v5 }
  0x13   :  { %v42_v18 = vsub.f32 %v40_v12, %v38_v9  ;;  %v45_v19 = vsub.f32 %v41_v13, %v39_v10  ;;  %v55_v20 = vadd.f32 1.0, %v54_v15  ;;  %p116_p8 = por %p115_p7, %p114_p6 }
  0x14   :  { %v53_v21 = vmul.f32 %v52_v16, %v50_v14  ;;  %v57_v22 = vadd.f32 1.0, %v56_v17 }
  0x15   :  { %v43_v23 = vadd.f32 1.0, %v42_v18  ;;  %v46_v24 = vadd.f32 1.0, %v45_v19  ;;  %p117_p9 = pnand %p116_p8, %p110_p5 }
  0x16   :  { %v58_v25 = vmul.f32 %v57_v22, %v55_v20 }
  0x17   :  { %v44_v26 = vmax.f32 %v43_v23, 0.0  ;;  %v47_v27 = vmax.f32 %v46_v24, 0.0 }
  0x18   :  { %v59_v28 = vadd.f32 %v58_v25, %v53_v21 }
  0x19   :  { %v48_v29 = vmul.f32 %v47_v27, %v44_v26 }
  0x1b   :  { %v60_v30 = vsub.f32 %v59_v28, %v48_v29 }
  0x1d   :  { %87 = vrcp.f32 %v60_v30 }
  0x2a   :  { %v88_v31 = vpop.eup %87 }
  0x2b   :  { %v62_v32 = vmul.f32 %v88_v31, %v48_v29 }
  0x2d   :  { %v63_v33 = vmax.f32 %v62_v32, 1e-06 }
  0x2f   :  { %v64_v34 = vsub.f32 1.0, %v63_v33 }
  0x31   :  { %67 = vst [vmem:[#allocation5] sm:$0xff] %v64_v34 }
  0x32   :  { %120 = shalt.err (!%p117_p9)
}
  0x33   :  { %77 = dma.vmem_to_hbm [thread:$0]  %s75_s13, 128, %s154_s1, [#allocation4]  }
  0x34   :  { %131 = dma.done.wait [#allocation4], 128  }
  0x35   :  { %132 = vsyncadd [#allocation4], 4294967168 }
  0x36   :  { %81 = vsyncpa [#allocation3], 1 }
  0x37   :  { %82 = vsyncpa [#allocation4], 1 }

</bundles_post_ra>
